<compile_context>
chip_gen: v6e
topology: v6e:2x2x1
jax: 0.10.0
libtpu: 0.0.40
codegen_flags: <defaults>
</compile_context>

<pallas_src>
import math

import jax
import jax.numpy as jnp
from jax.experimental import pallas as pl
from jax.experimental.pallas import tpu as pltpu


# ----------------------------------------------------------------------------
# Helpers
# ----------------------------------------------------------------------------
_IM2COL_MAX_CIN = 8   # below this: single concat-dot; else K*K accumulated dots


def _vmem_budget_bytes():
    """Generation-aware VMEM budget (v5e/v6e: 128 MiB physical, v7x: 64 MiB)."""
    cap = 64 << 20                                  # conservative fallback
    try:
        cap = int(getattr(pltpu.get_tpu_info(), "vmem_capacity_bytes", cap))
    except Exception:
        pass
    tile_budget = int(cap * 0.70)   # ~44 MiB on v7x, ~90 MiB on v5e/v6e
    vmem_limit = int(cap * 0.80)    # explicit scoped-VMEM cap, below physical
    return tile_budget, vmem_limit


def _pick_batch_tile(n, per_item_bytes, budget_bytes):
    """Largest divisor of n whose estimated footprint fits the budget."""
    for cand in range(n, 0, -1):
        if n % cand == 0 and cand * per_item_bytes <= budget_bytes:
            return cand
    return 1


def _cap_for_pipeline(n, bt, min_steps=2):
    """Shrink the batch tile so the grid has >= min_steps steps (pipeline
    overlap; also the only axis sharded across v7x's 2 TensorCores)."""
    if n < min_steps:
        return bt
    while n // bt < min_steps:
        nb = bt - 1
        while nb > 1 and n % nb:
            nb -= 1
        bt = max(nb, 1)
    return bt


def _conv_vmem_per_image(H, W, Cin, Cout, K, pad, stride, in_isz, cds, out_isz,
                         res_isz, use_im2col, has_short, has_res):
    """Rough per-image VMEM footprint (double-buffered blocks + working set)."""
    Hp, Wp = H + 2 * pad, W + 2 * pad
    Hout = (Hp - K) // stride + 1
    Wout = (Wp - K) // stride + 1
    M = Hout * Wout
    b = 2 * H * W * Cin * in_isz            # double-buffered input block
    b += H * W * Cin * 4                    # f32 relu(bn(x)) value
    b += Hp * Wp * Cin * 4                  # padded f32 scratch
    if use_im2col:
        b += M * K * K * Cin * (4 + cds)    # patch + low-precision copy for MXU
    else:
        b += M * Cin * (4 + cds)            # one tap at a time (transient)
    b += 2 * M * Cout * 4                   # f32 accumulator / epilogue temps
    b += 2 * M * Cout * out_isz             # double-buffered output block
    if has_short:
        b += M * Cout * 4 + 2 * M * Cout * out_isz
    if has_res:
        b += 2 * M * Cout * res_isz
    return b


def _bn_affine(sums, sumsqs, count, gamma, beta, eps=1e-5):
    """Training-mode BatchNorm: fold batch stats into per-channel scale/bias.
    Single-pass variance (E[x^2]-E[x]^2) computed from f32 partials, clamped
    at 0 to guard against cancellation."""
    mean = sums / count
    var = jnp.maximum(sumsqs / count - mean * mean, 0.0)
    scale = gamma * jax.lax.rsqrt(var + eps)
    bias = beta - mean * scale
    return scale.astype(jnp.float32), bias.astype(jnp.float32)


# ----------------------------------------------------------------------------
# Fused kernel: BN+ReLU prologue -> conv (+shortcut conv) (+residual)
#               -> per-channel stats epilogue
# ----------------------------------------------------------------------------
def _make_fused_kernel(*, stride, ksize, pad, hout, wout, cout,
                       use_im2col, has_short, has_residual, want_stats,
                       compute_dtype):
    def kernel(*refs):
        it = iter(refs)
        x_ref = next(it)
        sb_ref = next(it)
        w_ref = next(it)
        ws_ref = next(it) if has_short else None
        res_ref = next(it) if has_residual else None
        o_ref = next(it)
        short_ref = next(it) if has_short else None
        psum_ref = next(it) if want_stats else None
        psumsq_ref = next(it) if want_stats else None
        pad_ref = next(it) if pad > 0 else None

        B, H, W, Cin = x_ref.shape
        M = B * hout * wout

        # --- BN + ReLU prologue (f32 elementwise: v5e VPU has no bf16 ALUs) ---
        sb = sb_ref[...].astype(jnp.float32)                    # (2, Cin)
        scale = sb[0:1, :].reshape(1, 1, 1, Cin)
        bias = sb[1:2, :].reshape(1, 1, 1, Cin)
        x = x_ref[...].astype(jnp.float32)
        y = jnp.maximum(x * scale + bias, 0.0)                  # f32

        # --- fused 1x1 stride-s shortcut conv (shares relu(bn1(x))) ---
        if has_short:
            tap0 = jax.lax.slice(
                y, (0, 0, 0, 0),
                (B, (hout - 1) * stride + 1, (wout - 1) * stride + 1, Cin),
                (1, stride, stride, 1)).reshape(M, Cin)
            sc = jnp.dot(tap0.astype(compute_dtype), ws_ref[...],
                         preferred_element_type=jnp.float32)
            short_ref[...] = sc.reshape(B, hout * wout, cout).astype(
                short_ref.dtype)

        # --- zero padding via VMEM scratch: border zero + one interior store
        #     (no full-tensor concatenate copies / relayouts) ---
        if pad > 0:
            Hp, Wp = H + 2 * pad, W + 2 * pad
            zdt = pad_ref.dtype
            pad_ref[:, 0:pad, :, :] = jnp.zeros((B, pad, Wp, Cin), zdt)
            pad_ref[:, Hp - pad:Hp, :, :] = jnp.zeros((B, pad, Wp, Cin), zdt)
            pad_ref[:, :, 0:pad, :] = jnp.zeros((B, Hp, pad, Cin), zdt)
            pad_ref[:, :, Wp - pad:Wp, :] = jnp.zeros((B, Hp, pad, Cin), zdt)
            pad_ref[:, pad:pad + H, pad:pad + W, :] = y
            ypad = pad_ref[...]
        else:
            ypad = y

        def tap(kh, kw):
            t = jax.lax.slice(
                ypad, (0, kh, kw, 0),
                (B, kh + (hout - 1) * stride + 1,
                 kw + (wout - 1) * stride + 1, Cin),
                (1, stride, stride, 1))
            return t.reshape(M, Cin)

        if use_im2col:
            # Tiny Cin: one (M, K*K*Cin) x (K*K*Cin, Cout) MXU matmul.
            cols = [tap(kh, kw) for kh in range(ksize) for kw in range(ksize)]
            patch = cols[0] if len(cols) == 1 else jnp.concatenate(cols, -1)
            out = jnp.dot(patch.astype(compute_dtype), w_ref[...],
                          preferred_element_type=jnp.float32)
        else:
            # K*K accumulated per-tap dots: no im2col patch materialization,
            # no lane-axis concatenate. bf16 cast happens right before the dot.
            out = None
            for kh in range(ksize):
                for kw in range(ksize):
                    w_tap = w_ref[kh * ksize + kw]               # (Cin, Cout)
                    contrib = jnp.dot(tap(kh, kw).astype(compute_dtype), w_tap,
                                      preferred_element_type=jnp.float32)
                    out = contrib if out is None else out + contrib

        # --- fused residual add (f32) ---
        if has_residual:
            out = out + res_ref[...].astype(jnp.float32).reshape(M, cout)

        # --- per-channel stats epilogue (f32 partial sums; feeds next BN) ---
        if want_stats:
            psum_ref[...] = jnp.sum(out, axis=0).reshape(1, 1, cout)
            psumsq_ref[...] = jnp.sum(out * out, axis=0).reshape(1, 1, cout)

        # Lane-major slab store (last dim = Cout; no 4D reshape relayout).
        o_ref[...] = out.reshape(B, hout * wout, cout).astype(o_ref.dtype)

    return kernel


def fused_conv_bn_relu(x, scale, bias, w, *, stride, pad, residual=None,
                       w_short=None, want_stats=True,
                       compute_dtype=jnp.bfloat16, out_dtype=None):
    """out = conv(relu(bn(x))) [+ residual]; optional fused 1x1 shortcut conv
    and per-channel (sum, sumsq) of the output for the next BatchNorm.

    x is NHWC; residual (if any) is an (N, Hout*Wout, Cout) slab.
    Returns (out_slab, shortcut_slab_or_None, stats_or_None)."""
    N, H, W, Cin = x.shape
    K = w.shape[0]
    Cout = w.shape[3]
    Hout = (H + 2 * pad - K) // stride + 1
    Wout = (W + 2 * pad - K) // stride + 1
    if out_dtype is None:
        out_dtype = x.dtype
    use_im2col = Cin < _IM2COL_MAX_CIN
    has_short = w_short is not None
    has_res = residual is not None

    cds = jnp.dtype(compute_dtype).itemsize
    ods = jnp.dtype(out_dtype).itemsize
    ids = jnp.dtype(x.dtype).itemsize
    rds = jnp.dtype(residual.dtype).itemsize if has_res else 0

    tile_budget, vmem_limit = _vmem_budget_bytes()
    # Block-index-invariant operands (weights / BN constants) are fetched once
    # by the pipeline but still occupy (double-buffered) VMEM — budget them.
    fixed = 2 * (K * K * Cin * Cout * cds) + 2 * 2 * Cin * 4
    if has_short:
        fixed += 2 * Cin * Cout * cds
    per_img = _conv_vmem_per_image(H, W, Cin, Cout, K, pad, stride, ids, cds,
                                   ods, rds, use_im2col, has_short, has_res)
    bt = _pick_batch_tile(N, per_img, max(tile_budget - fixed, per_img))
    bt = _cap_for_pipeline(N, bt)
    G = N // bt
    # TODO(synk): add an Hout-tile grid axis (with halo) for the case where a
    # single image's working set exceeds the VMEM budget (bt == 1 fallback).

    if use_im2col:
        w_k = w.reshape(K * K * Cin, Cout).astype(compute_dtype)
    else:
        w_k = w.reshape(K * K, Cin, Cout).astype(compute_dtype)
    sb = jnp.stack([scale, bias], axis=0).astype(jnp.float32)      # (2, Cin)
    ws2 = (w_short.reshape(Cin, Cout).astype(compute_dtype)
           if has_short else None)

    kernel = _make_fused_kernel(
        stride=stride, ksize=K, pad=pad, hout=Hout, wout=Wout, cout=Cout,
        use_im2col=use_im2col, has_short=has_short, has_residual=has_res,
        want_stats=want_stats, compute_dtype=compute_dtype)

    w_ndim = w_k.ndim
    in_specs = [
        pl.BlockSpec((bt, H, W, Cin), lambda n: (n, 0, 0, 0)),
        pl.BlockSpec((2, Cin), lambda n: (0, 0)),
        pl.BlockSpec(tuple(w_k.shape), lambda n: (0,) * w_ndim),
    ]
    args = [x, sb, w_k]
    if has_short:
        in_specs.append(pl.BlockSpec((Cin, Cout), lambda n: (0, 0)))
        args.append(ws2)
    if has_res:
        in_specs.append(pl.BlockSpec((bt, Hout * Wout, Cout),
                                     lambda n: (n, 0, 0)))
        args.append(residual)

    out_shapes = [jax.ShapeDtypeStruct((N, Hout * Wout, Cout), out_dtype)]
    out_specs = [pl.BlockSpec((bt, Hout * Wout, Cout), lambda n: (n, 0, 0))]
    if has_short:
        out_shapes.append(jax.ShapeDtypeStruct((N, Hout * Wout, Cout),
                                               out_dtype))
        out_specs.append(pl.BlockSpec((bt, Hout * Wout, Cout),
                                      lambda n: (n, 0, 0)))
    if want_stats:
        out_shapes += [jax.ShapeDtypeStruct((G, 1, Cout), jnp.float32)] * 2
        out_specs += [pl.BlockSpec((1, 1, Cout), lambda n: (n, 0, 0))] * 2

    scratch = []
    if pad > 0:
        scratch.append(pltpu.VMEM((bt, H + 2 * pad, W + 2 * pad, Cin),
                                  jnp.float32))

    results = pl.pallas_call(
        kernel,
        out_shape=tuple(out_shapes),
        grid=(G,),
        in_specs=in_specs,
        out_specs=tuple(out_specs),
        scratch_shapes=scratch,
        compiler_params=pltpu.CompilerParams(
            dimension_semantics=("parallel",),   # partial stats -> race-free
            vmem_limit_bytes=vmem_limit),
    )(*args)

    idx = 0
    out = results[idx]; idx += 1
    shortcut = None
    if has_short:
        shortcut = results[idx]; idx += 1
    stats = None
    if want_stats:
        stats = (results[idx].sum(axis=(0, 1)),
                 results[idx + 1].sum(axis=(0, 1)))
    return out, shortcut, stats


# ----------------------------------------------------------------------------
# Standalone per-channel stats (only for the very first input of the block
# chain; every later BatchNorm gets its stats from a conv-kernel epilogue).
# ----------------------------------------------------------------------------
def _stats_kernel(x_ref, psum_ref, psumsq_ref):
    B, H, W, C = x_ref.shape
    xf = x_ref[...].astype(jnp.float32).reshape(B * H * W, C)
    psum_ref[...] = jnp.sum(xf, axis=0).reshape(1, 1, C)
    psumsq_ref[...] = jnp.sum(xf * xf, axis=0).reshape(1, 1, C)


def channel_stats_pallas(x):
    N, H, W, C = x.shape
    tile_budget, vmem_limit = _vmem_budget_bytes()
    per_img = H * W * C * (2 * jnp.dtype(x.dtype).itemsize + 4)
    bt = _pick_batch_tile(N, per_img, tile_budget)
    bt = _cap_for_pipeline(N, bt)
    G = N // bt
    psum, psumsq = pl.pallas_call(
        _stats_kernel,
        out_shape=(jax.ShapeDtypeStruct((G, 1, C), jnp.float32),
                   jax.ShapeDtypeStruct((G, 1, C), jnp.float32)),
        grid=(G,),
        in_specs=[pl.BlockSpec((bt, H, W, C), lambda n: (n, 0, 0, 0))],
        out_specs=(pl.BlockSpec((1, 1, C), lambda n: (n, 0, 0)),
                   pl.BlockSpec((1, 1, C), lambda n: (n, 0, 0))),
        compiler_params=pltpu.CompilerParams(
            dimension_semantics=("parallel",),
            vmem_limit_bytes=vmem_limit),
    )(x)
    return psum.sum(axis=(0, 1)), psumsq.sum(axis=(0, 1))


# ----------------------------------------------------------------------------
# BasicBlock / NetworkBlock forward (Pallas path)
# ----------------------------------------------------------------------------
def basic_block_forward_pallas(x, p, stride, stats_in, want_out_stats,
                               compute_dtype, act_dtype):
    N, H, W, Cin = x.shape
    Cout = p["conv1_w"].shape[3]
    equal = (Cin == Cout)                     # PyTorch equalInOut

    if stats_in is None:
        s0, ss0 = channel_stats_pallas(x)
    else:
        s0, ss0 = stats_in
    scale1, bias1 = _bn_affine(s0, ss0, N * H * W,
                               p["bn1_gamma"], p["bn1_beta"])

    # Kernel A: relu(bn1(x)) -> conv1 (3x3, stride) [+ fused 1x1 shortcut conv]
    #           + stats(out1) for bn2.
    out1_slab, shortcut, st1 = fused_conv_bn_relu(
        x, scale1, bias1, p["conv1_w"], stride=stride, pad=1,
        w_short=None if equal else p["short_w"], want_stats=True,
        compute_dtype=compute_dtype, out_dtype=act_dtype)

    Ho = (H + 2 - 3) // stride + 1
    Wo = (W + 2 - 3) // stride + 1
    out1 = out1_slab.reshape(N, Ho, Wo, Cout)          # free XLA reshape

    if equal:
        shortcut = x.reshape(N, H * W, Cin)            # identity shortcut slab

    scale2, bias2 = _bn_affine(st1[0], st1[1], N * Ho * Wo,
                               p["bn2_gamma"], p["bn2_beta"])

    # TODO(synk): dropout omitted — dropRate=0.0 makes F.dropout the identity.
    # Kernel B: relu(bn2(out1)) -> conv2 (3x3, s=1) + residual
    #           + stats(block output) for the next block's bn1.
    # (Stats are computed from the f32 pre-cast values; the stored activation
    #  is act_dtype — a small, documented mismatch when act_dtype=bf16.)
    out2_slab, _, st2 = fused_conv_bn_relu(
        out1, scale2, bias2, p["conv2_w"], stride=1, pad=1,
        residual=shortcut, want_stats=want_out_stats,
        compute_dtype=compute_dtype, out_dtype=act_dtype)
    return out2_slab.reshape(N, Ho, Wo, Cout), st2


def network_block_forward(x_nchw, layer_params, stride,
                          compute_dtype=jnp.bfloat16, act_dtype=jnp.bfloat16):
    x = jnp.transpose(x_nchw, (0, 2, 3, 1))    # NCHW -> NHWC (channels on lanes)
    stats = None
    n_layers = len(layer_params)
    for i, p in enumerate(layer_params):
        x, stats = basic_block_forward_pallas(
            x, p, stride if i == 0 else 1,
            stats_in=stats, want_out_stats=(i + 1 < n_layers),
            compute_dtype=compute_dtype, act_dtype=act_dtype)
    return jnp.transpose(x, (0, 3, 1, 2)).astype(x_nchw.dtype)   # NHWC -> NCHW


# ----------------------------------------------------------------------------
# Pure-JAX reference (for correctness check)
# ----------------------------------------------------------------------------
def conv2d_ref(x, w, *, stride, padding):
    return jax.lax.conv_general_dilated(
        x, w, window_strides=(stride, stride),
        padding=[(padding, padding), (padding, padding)],
        dimension_numbers=("NHWC", "HWIO", "NHWC"))


def bn_relu_ref(x, gamma, beta, eps=1e-5):
    mean = jnp.mean(x, axis=(0, 1, 2))
    var = jnp.mean((x - mean) ** 2, axis=(0, 1, 2))
    return jnp.maximum((x - mean) / jnp.sqrt(var + eps) * gamma + beta, 0.0)


def basic_block_ref(x, p, stride):
    equal = x.shape[-1] == p["conv1_w"].shape[3]
    a = bn_relu_ref(x, p["bn1_gamma"], p["bn1_beta"])
    out = conv2d_ref(a, p["conv1_w"], stride=stride, padding=1)
    out = bn_relu_ref(out, p["bn2_gamma"], p["bn2_beta"])
    out = conv2d_ref(out, p["conv2_w"], stride=1, padding=1)
    short = x if equal else conv2d_ref(a, p["short_w"], stride=stride, padding=0)
    return out + short


def network_block_ref(x_nchw, layer_params, stride):
    x = jnp.transpose(x_nchw, (0, 2, 3, 1))
    for i, p in enumerate(layer_params):
        x = basic_block_ref(x, p, stride if i == 0 else 1)
    return jnp.transpose(x, (0, 3, 1, 2))


# ----------------------------------------------------------------------------
# Deterministic parameter init (shapes from BasicBlock.__init__)
# ----------------------------------------------------------------------------
def init_basic_block_params(key, in_planes, out_planes):
    ks = jax.random.split(key, 7)

    def conv_init(k, kh, kw, cin, cout):
        n = kh * kw * cout
        return jax.random.normal(k, (kh, kw, cin, cout), jnp.float32) * math.sqrt(2.0 / n)

    p = {
        "bn1_gamma": 1.0 + 0.1 * jax.random.normal(ks[0], (in_planes,), jnp.float32),
        "bn1_beta": 0.1 * jax.random.normal(ks[1], (in_planes,), jnp.float32),
        "conv1_w": conv_init(ks[2], 3, 3, in_planes, out_planes),
        "bn2_gamma": 1.0 + 0.1 * jax.random.normal(ks[3], (out_planes,), jnp.float32),
        "bn2_beta": 0.1 * jax.random.normal(ks[4], (out_planes,), jnp.float32),
        "conv2_w": conv_init(ks[5], 3, 3, out_planes, out_planes),
    }
    if in_planes != out_planes:
        p["short_w"] = conv_init(ks[6], 1, 1, in_planes, out_planes)
    return p


def init_network_block_params(key, nb_layers, in_planes, out_planes):
    params = []
    for i in range(int(nb_layers)):
        key, sub = jax.random.split(key)
        params.append(init_basic_block_params(
            sub, in_planes if i == 0 else out_planes, out_planes))
    return params


# ----------------------------------------------------------------------------
if __name__ == "__main__":
    key = jax.random.PRNGKey(0)
    kx, kp = jax.random.split(key)

    # NetworkBlock(nb_layers=2, in_planes=4, out_planes=8, block=BasicBlock, stride=2)
    N, C_in, H, W = 2, 4, 16, 16
    out_planes, nb_layers, stride = 8, 2, 2

    x = jax.random.normal(kx, (N, C_in, H, W), jnp.float32)   # NCHW like PyTorch
    params = init_network_block_params(kp, nb_layers, C_in, out_planes)

    y_ref = jax.block_until_ready(network_block_ref(x, params, stride))

    # Exact-math path (f32 matmuls + f32 activations): tight algorithm check.
    y_f32 = jax.block_until_ready(network_block_forward(
        x, params, stride, compute_dtype=jnp.float32, act_dtype=jnp.float32))
    assert y_f32.shape == (N, out_planes, H // stride, W // stride), y_f32.shape
    err_f32 = float(jnp.max(jnp.abs(y_f32 - y_ref)))
    assert err_f32 < 1e-3, f"f32 path mismatch vs reference: {err_f32}"

    # Production path (bf16 MXU matmuls + bf16 inter-kernel activations).
    y_bf16 = jax.block_until_ready(network_block_forward(x, params, stride))
    assert y_bf16.shape == (N, out_planes, H // stride, W // stride), y_bf16.shape
    rel_err = float(jnp.max(jnp.abs(y_bf16.astype(jnp.float32) - y_ref)) /
                    (jnp.max(jnp.abs(y_ref)) + 1e-6))
    assert rel_err < 0.15, f"bf16 path mismatch vs reference: {rel_err}"

    print("KERNEL_OK")
</pallas_src>

<mosaic_0001>
module attributes {stable_mosaic.version = 11 : i64} {
  func.func @_stats_kernel(%arg0: i32, %arg1: memref<1x16x16x4xf32, #tpu.memory_space<vmem>>, %arg2: memref<1x1x4xf32, #tpu.memory_space<vmem>>, %arg3: memref<1x1x4xf32, #tpu.memory_space<vmem>>) attributes {dimension_semantics = [#tpu.dimension_semantics<parallel>], iteration_bounds = array<i64: 2>, scalar_prefetch = 0 : i64, scratch_operands = 0 : i64, tpu.core_type = #tpu.core_type<tc>, window_params = [{transform_indices = @transform_0, window_bounds = array<i64: 1, 16, 16, 4>}, {transform_indices = @transform_1, window_bounds = array<i64: 1, 1, 4>}, {transform_indices = @transform_2, window_bounds = array<i64: 1, 1, 4>}]} {
    %c0 = arith.constant 0 : index
    %c0_0 = arith.constant 0 : index
    %c0_1 = arith.constant 0 : index
    %c0_2 = arith.constant 0 : index
    %0 = vector.load %arg1[%c0, %c0_0, %c0_1, %c0_2] : memref<1x16x16x4xf32, #tpu.memory_space<vmem>>, vector<1x16x16x4xf32>
    %1 = vector.shape_cast %0 : vector<1x16x16x4xf32> to vector<256x4xf32>
    %cst = arith.constant dense<0.000000e+00> : vector<4xf32>
    %2 = vector.multi_reduction <add>, %1, %cst [0] : vector<256x4xf32> to vector<4xf32>
    %3 = vector.shape_cast %2 : vector<4xf32> to vector<1x1x4xf32>
    %c0_3 = arith.constant 0 : index
    %c0_4 = arith.constant 0 : index
    %c0_5 = arith.constant 0 : index
    %4 = vector.load %arg2[%c0_3, %c0_4, %c0_5] : memref<1x1x4xf32, #tpu.memory_space<vmem>>, vector<1x1x4xf32>
    tpu.vector_store %arg2[%c0_3, %c0_4, %c0_5], %3 {strides = array<i32>} : memref<1x1x4xf32, #tpu.memory_space<vmem>>, vector<1x1x4xf32>,
    %5 = arith.mulf %1, %1 : vector<256x4xf32>
    %cst_6 = arith.constant dense<0.000000e+00> : vector<4xf32>
    %6 = vector.multi_reduction <add>, %5, %cst_6 [0] : vector<256x4xf32> to vector<4xf32>
    %7 = vector.shape_cast %6 : vector<4xf32> to vector<1x1x4xf32>
    %c0_7 = arith.constant 0 : index
    %c0_8 = arith.constant 0 : index
    %c0_9 = arith.constant 0 : index
    %8 = vector.load %arg3[%c0_7, %c0_8, %c0_9] : memref<1x1x4xf32, #tpu.memory_space<vmem>>, vector<1x1x4xf32>
    tpu.vector_store %arg3[%c0_7, %c0_8, %c0_9], %7 {strides = array<i32>} : memref<1x1x4xf32, #tpu.memory_space<vmem>>, vector<1x1x4xf32>,
    return
  }
  func.func @transform_0(%arg0: i32) -> (i32, i32, i32, i32) {
    %c0_i32 = arith.constant 0 : i32
    %c0_i32_0 = arith.constant 0 : i32
    %c0_i32_1 = arith.constant 0 : i32
    %c0_i32_2 = arith.constant 0 : i32
    return %arg0, %c0_i32, %c0_i32_0, %c0_i32_1 : i32, i32, i32, i32
  }
  func.func @transform_1(%arg0: i32) -> (i32, i32, i32) {
    %c0_i32 = arith.constant 0 : i32
    %c0_i32_0 = arith.constant 0 : i32
    %c0_i32_1 = arith.constant 0 : i32
    return %arg0, %c0_i32, %c0_i32_0 : i32, i32, i32
  }
  func.func @transform_2(%arg0: i32) -> (i32, i32, i32) {
    %c0_i32 = arith.constant 0 : i32
    %c0_i32_0 = arith.constant 0 : i32
    %c0_i32_1 = arith.constant 0 : i32
    return %arg0, %c0_i32, %c0_i32_0 : i32, i32, i32
  }
}

</mosaic_0001>

<bundles_post_ra>
// kernel: tpu_custom_call.1
= control target key start
LH: loop header
LB: loop body
LE: loop exit
PB: predicated region body
PF: predicated region fallthrough
CT: control target
= control target key end

     0   :  { %8 = vsyncpa [#allocation3], 0  ;;  %s864_s0 = inlined_call_operand.vmem [shape: f32[2,16,16,4], index: 0, kind: input, shape index: {}]   ;;  %s865_s1 = inlined_call_operand.hbm [shape: f32[2,1,4], index: 1, kind: output, shape index: {0}]   ;;  %s866_s2 = inlined_call_operand.hbm [shape: f32[2,1,4], index: 2, kind: output, shape index: {1}]  }
   0x1   :  { %10 = vsyncpa [#allocation3 + $0x1], 0 }
   0x2   :  { %11 = vsyncpa [#allocation5], 0 }
   0x3   :  { %13 = vsyncpa [#allocation5 + $0x1], 0  ;;  %s634_s9 = smov 0   ;;  %s636_s10 = smov 0  }
   0x4   :  { %s638_s11 = smov 0   ;;  %s640_s12 = smov 0  }
   0x5 LB: > { %s655_s13 = sadd.s32 4294967295, %s615_s12   ;;  %s470_s14 = sadd.s32 4294967294, %s615_s12   ;;  %s615_s12 = sphi %s640_s12, %s872_s12   ;;  %s611_s11 = sphi %s638_s11, %s871_s11   ;;  %s607_s10 = sphi %s636_s10, %s870_s10   ;;  %s603_s9 = sphi %s634_s9, %s869_s9  }
   0x6   : > { %s659_s15 = sadd.s32 1, %s615_s12   ;;  %s52_s16 = sadd.s32 1, %s611_s11 }
   0x7   : > { %s49_s17 = ssub.s32 %s615_s12, %s659_s15  ;;  %p62_p0 = scmp.ne.s32.totalorder %s611_s11, %s607_s10 }
   0x8   : > { %p50_p1 = scmp.eq.s32.totalorder %s49_s17, 0  ;;  %p63_p2 = scmp.eq.s32.totalorder %s655_s13, 1 }
   0x9   : > { %p68_p3 = scmp.ne.s32.totalorder %s607_s10, %s603_s9  ;;  %p69_p4 = scmp.eq.s32.totalorder %s470_s14, 1 }
   0xa   : > { %s670_s18 = scalar_select %p50_p1, %s611_s11, %s52_s16  }
   0xb   : > { %p672_p5 = por %p63_p2, %p62_p0  ;;  %p676_p6 = por %p69_p4, %p68_p3 }
   0xc   : > { %p473_p7 = scmp.ge.s32.totalorder %s615_s12, 1  ;;  %p121_p8 = scmp.lt.s32.totalorder %s615_s12, 3 }
   0xe   : > { %p122_p9 = pnand %p473_p7, %p121_p8 }
   0xf   : > { %p146_p10 = scmp.lt.s32.totalorder (!%p122_p9), %s655_s13, 1  ;;  %s779_s26 = sand.u32 (!%p122_p9), 1, %s607_s10  }
  0x10   : > { %125 = sbr.rel (%p122_p9) target bundleno = 142 (0x8e), region = 24  ;;  %s139_s27 = scalar_lea.vmem (!%p122_p9), [#allocation2], %s779_s26 }
  0x11   : > { %s374_s28 = sshll.u32 (!%p122_p9), %s139_s27, 4  ;;  %s476_s29 = sshll.u32 (!%p122_p9), %s655_s13, 4  ;;  %s787_s28 = int_to_ptr.vmem [resolvable:$true] %s374_s28 }
  0x12   : > { %s795_s4 = scalar_lea.hbm (!%p122_p9), %s865_s1, %s476_s29  ;;  %s358_s5 = scalar_lea.sflag (!%p122_p9), [#allocation3], %s779_s26 }
  0x13   : > { %s525_s6 = scalar_lea.vmem (!%p122_p9), %s787_s28, 16  ;;  %s617_s7 = smov (!%p122_p9), [#allocation2]  }
  0x14   : > { %p526_p11 = scmp.ne.s32.totalorder (!%p122_p9), %s787_s28, %s525_s6  ;;  %s529_s8 = sshll.u32 (!%p122_p9), %s617_s7, 4  ;;  %s530_s8 = int_to_ptr.vmem [resolvable:$false] %s529_s8 }
  0x15   : > { %s147_s21 = scalar_select %p146_p10, %s655_s13, 1  ;;  %vm183_vm0 = vcmask 31744   ;;  %vm253_vm1 = vcmask 24576  }
  0x16   : > { %p527_p12 = pnand %p526_p11, %p672_p5  ;;  %s531_s14 = scalar_lea.vmem %s530_s8, 32 }
  0x17   : > { %s480_s22 = sshll.u32 %s147_s21, 8  ;;  %p532_p0 = scmp.lt.s32.totalorder %s787_s28, %s530_s8 }
  0x18   : > { %s687_s25 = scalar_lea.vmem %s864_s0, %s480_s22  ;;  %p528_p13 = pneg %p527_p12 }
  0x19   : > { %v151_v0 = vld [vmem:[%s687_s25] sm:$0xff]  ;;  %v152_v1 = vld [vmem:[%s687_s25 + $0x8] sm:$0xff]  ;;  %v153_v2 = vld [vmem:[%s687_s25 + $0x10] sm:$0xff]  ;;  %p533_p1 = scmp.lt.s32.totalorder %s531_s14, %s525_s6 }
  0x1a   : > { %v184_v3 = vsel %vm183_vm0, %v151_v0, 0.0  ;;  %v185_v4 = vsel %vm183_vm0, %v152_v1, 0.0  ;;  %v187_v5 = vsel %vm183_vm0, %v153_v2, 0.0  ;;  %v154_v6 = vld [vmem:[%s687_s25 + $0x18] sm:$0xff]  ;;  %v155_v9 = vld [vmem:[%s687_s25 + $0x20] sm:$0xff]  ;;  %v156_v12 = vld [vmem:[%s687_s25 + $0x28] sm:$0xff]  ;;  %v255_v27 = vmul.f32 %v151_v0, %v151_v0 }
  0x1b   : > { %v186_v7 = vadd.f32 %v185_v4, %v184_v3  ;;  %v189_v8 = vsel %vm183_vm0, %v154_v6, 0.0  ;;  %v191_v11 = vsel %vm183_vm0, %v155_v9, 0.0  ;;  %v193_v14 = vsel %vm183_vm0, %v156_v12, 0.0  ;;  %v157_v15 = vld [vmem:[%s687_s25 + $0x30] sm:$0xff]  ;;  %v158_v18 = vld [vmem:[%s687_s25 + $0x38] sm:$0xff]  ;;  %v159_v21 = vld [vmem:[%s687_s25 + $0x40] sm:$0xff]  ;;  %p534_p2 = por %p533_p1, %p532_p0 }
  0x1c   : > { %v195_v17 = vsel %vm183_vm0, %v157_v15, 0.0  ;;  %v197_v20 = vsel %vm183_vm0, %v158_v18, 0.0  ;;  %v199_v23 = vsel %vm183_vm0, %v159_v21, 0.0  ;;  %v160_v24 = vld [vmem:[%s687_s25 + $0x48] sm:$0xff]  ;;  %v256_v28 = vmul.f32 %v152_v1, %v152_v1  ;;  %v161_v30 = vld [vmem:[%s687_s25 + $0x50] sm:$0xff]  ;;  %v162_v32 = vld [vmem:[%s687_s25 + $0x58] sm:$0xff] }
  0x1d   : > { %v188_v10 = vadd.f32 %v187_v5, %v186_v7  ;;  %v201_v26 = vsel %vm183_vm0, %v160_v24, 0.0  ;;  %v257_v29 = vmul.f32 %v153_v2, %v153_v2  ;;  %v203_v33 = vsel %vm183_vm0, %v161_v30, 0.0  ;;  %v163_v41 = vld [vmem:[%s687_s25 + $0x60] sm:$0xff]  ;;  %v164_v47 = vld [vmem:[%s687_s25 + $0x68] sm:$0xff]  ;;  %v165_v53 = vld [vmem:[%s687_s25 + $0x70] sm:$0xff]  ;;  %p535_p3 = pnand %p534_p2, %p528_p13 }
  0x1e   : > { %v258_v34 = vmul.f32 %v154_v6, %v154_v6  ;;  %v205_v36 = vsel %vm183_vm0, %v162_v32, 0.0  ;;  %v259_v37 = vmul.f32 %v155_v9, %v155_v9  ;;  %v287_v38 = vsel %vm183_vm0, %v255_v27, 0.0  ;;  %v166_v59 = vld [vmem:[%s687_s25 + $0x78] sm:$0xff]  ;;  %v167_v1 = vld [vmem:[%s687_s25 + $0x80] sm:$0xff]  ;;  %v168_v7 = vld [vmem:[%s687_s25 + $0x88] sm:$0xff] }
  0x1f   : > { %v190_v13 = vadd.f32 %v189_v8, %v188_v10  ;;  %v288_v39 = vsel %vm183_vm0, %v256_v28, 0.0  ;;  %v290_v40 = vsel %vm183_vm0, %v257_v29, 0.0  ;;  %v207_v44 = vsel %vm183_vm0, %v163_v41, 0.0 }
  0x20   : > { %v289_v43 = vadd.f32 %v288_v39, %v287_v38  ;;  %v260_v45 = vmul.f32 %v156_v12, %v156_v12  ;;  %v292_v46 = vsel %vm183_vm0, %v258_v34, 0.0  ;;  %v209_v50 = vsel %vm183_vm0, %v164_v47, 0.0 }
  0x21   : > { %v192_v16 = vadd.f32 %v191_v11, %v190_v13  ;;  %v261_v51 = vmul.f32 %v157_v15, %v157_v15  ;;  %v294_v52 = vsel %vm183_vm0, %v259_v37, 0.0  ;;  %v211_v56 = vsel %vm183_vm0, %v165_v53, 0.0  ;;  %v169_v13 = vld [vmem:[%s687_s25 + $0x90] sm:$0xff] }
  0x22   : > { %v291_v49 = vadd.f32 %v290_v40, %v289_v43  ;;  %v262_v57 = vmul.f32 %v158_v18, %v158_v18  ;;  %v296_v58 = vsel %vm183_vm0, %v260_v45, 0.0  ;;  %v213_v62 = vsel %vm183_vm0, %v166_v59, 0.0  ;;  %v173_v37 = vld [vmem:[%s687_s25 + $0xb0] sm:$0xff]  ;;  %v174_v43 = vld [vmem:[%s687_s25 + $0xb8] sm:$0xff] }
  0x23   : > { %v194_v19 = vadd.f32 %v193_v14, %v192_v16  ;;  %v263_v63 = vmul.f32 %v159_v21, %v159_v21  ;;  %v298_v0 = vsel %vm183_vm0, %v261_v51, 0.0  ;;  %v215_v4 = vsel %vm183_vm0, %v167_v1, 0.0 }
  0x24   : > { %v293_v55 = vadd.f32 %v292_v46, %v291_v49  ;;  %v264_v5 = vmul.f32 %v160_v24, %v160_v24  ;;  %v300_v6 = vsel %vm183_vm0, %v262_v57, 0.0  ;;  %v217_v10 = vsel %vm183_vm0, %v168_v7, 0.0  ;;  %v175_v49 = vld [vmem:[%s687_s25 + $0xc0] sm:$0xff] }
  0x25   : > { %v196_v22 = vadd.f32 %v195_v17, %v194_v19  ;;  %v265_v11 = vmul.f32 %v161_v30, %v161_v30  ;;  %v302_v12 = vsel %vm183_vm0, %v263_v63, 0.0  ;;  %v219_v16 = vsel %vm183_vm0, %v169_v13, 0.0  ;;  %v170_v19 = vld [vmem:[%s687_s25 + $0x98] sm:$0xff] }
  0x26   : > { %v295_v61 = vadd.f32 %v294_v52, %v293_v55  ;;  %v266_v17 = vmul.f32 %v162_v32, %v162_v32  ;;  %v304_v18 = vsel %vm183_vm0, %v264_v5, 0.0  ;;  %v268_v29 = vmul.f32 %v164_v47, %v164_v47  ;;  %v176_v55 = vld [vmem:[%s687_s25 + $0xc8] sm:$0xff] }
  0x27   : > { %v198_v25 = vadd.f32 %v197_v20, %v196_v22  ;;  %v221_v22 = vsel %vm183_vm0, %v170_v19, 0.0  ;;  %v306_v24 = vsel %vm183_vm0, %v265_v11, 0.0  ;;  %v227_v40 = vsel %vm183_vm0, %v173_v37, 0.0 }
  0x28   : > { %v297_v3 = vadd.f32 %v296_v58, %v295_v61  ;;  %v308_v30 = vsel %vm183_vm0, %v266_v17, 0.0  ;;  %v229_v46 = vsel %vm183_vm0, %v174_v43, 0.0  ;;  %v271_v47 = vmul.f32 %v167_v1, %v167_v1  ;;  %v177_v61 = vld [vmem:[%s687_s25 + $0xd0] sm:$0xff] }
  0x29   : > { %v200_v31 = vadd.f32 %v199_v23, %v198_v25  ;;  %v267_v23 = vmul.f32 %v163_v41, %v163_v41  ;;  %v171_v25 = vld [vmem:[%s687_s25 + $0xa0] sm:$0xff]  ;;  %v270_v41 = vmul.f32 %v166_v59, %v166_v59  ;;  %v231_v52 = vsel %vm183_vm0, %v175_v49, 0.0 }
  0x2a   : > { %v299_v9 = vadd.f32 %v298_v0, %v297_v3  ;;  %v223_v28 = vsel %vm183_vm0, %v171_v25, 0.0  ;;  %v233_v58 = vsel %vm183_vm0, %v176_v55, 0.0  ;;  %v273_v59 = vmul.f32 %v169_v13, %v169_v13  ;;  %v178_v3 = vld [vmem:[%s687_s25 + $0xd8] sm:$0xff] }
  0x2b   : > { %v202_v35 = vadd.f32 %v201_v26, %v200_v31  ;;  %v172_v31 = vld [vmem:[%s687_s25 + $0xa8] sm:$0xff]  ;;  %v235_v0 = vsel %vm183_vm0, %v177_v61, 0.0  ;;  %v274_v1 = vmul.f32 %v170_v19, %v170_v19  ;;  %v277_v19 = vmul.f32 %v173_v37, %v173_v37 }
  0x2c   : > { %v301_v15 = vadd.f32 %v300_v6, %v299_v9  ;;  %v225_v34 = vsel %vm183_vm0, %v172_v31, 0.0  ;;  %v237_v6 = vsel %vm183_vm0, %v178_v3, 0.0  ;;  %v179_v9 = vld [vmem:[%s687_s25 + $0xe0] sm:$0xff]  ;;  %v276_v13 = vmul.f32 %v172_v31, %v172_v31 }
  0x2d   : > { %v204_v42 = vadd.f32 %v203_v33, %v202_v35  ;;  %v269_v35 = vmul.f32 %v165_v53, %v165_v53  ;;  %v272_v53 = vmul.f32 %v168_v7, %v168_v7  ;;  %v275_v7 = vmul.f32 %v171_v25, %v171_v25 }
  0x2e   : > { %v303_v21 = vadd.f32 %v302_v12, %v301_v15  ;;  %v239_v12 = vsel %vm183_vm0, %v179_v9, 0.0  ;;  %v180_v15 = vld [vmem:[%s687_s25 + $0xe8] sm:$0xff]  ;;  %v278_v25 = vmul.f32 %v174_v43, %v174_v43  ;;  %v279_v31 = vmul.f32 %v175_v49, %v175_v49 }
  0x2f   : > { %v206_v48 = vadd.f32 %v205_v36, %v204_v42  ;;  %v310_v36 = vsel %vm183_vm0, %v267_v23, 0.0  ;;  %v312_v42 = vsel %vm183_vm0, %v268_v29, 0.0  ;;  %v282_v43 = vmul.f32 %v178_v3, %v178_v3 }
  0x30   : > { %v305_v27 = vadd.f32 %v304_v18, %v303_v21  ;;  %v241_v18 = vsel %vm183_vm0, %v180_v15, 0.0  ;;  %v181_v21 = vld [vmem:[%s687_s25 + $0xf0] sm:$0xff] }
  0x31   : > { %v208_v54 = vadd.f32 %v207_v44, %v206_v48  ;;  %v314_v48 = vsel %vm183_vm0, %v269_v35, 0.0  ;;  %v280_v35 = vmul.f32 %v176_v55, %v176_v55  ;;  %v285_v55 = vmul.f32 %v181_v21, %v181_v21 }
  0x32   : > { %v307_v33 = vadd.f32 %v306_v24, %v305_v27  ;;  %v243_v24 = vsel %vm183_vm0, %v181_v21, 0.0  ;;  %v182_v27 = vld [vmem:[%s687_s25 + $0xf8] sm:$0xff] }
  0x33   : > { %v210_v60 = vadd.f32 %v209_v50, %v208_v54  ;;  %v316_v54 = vsel %vm183_vm0, %v270_v41, 0.0 }
  0x34   : > { %v309_v39 = vadd.f32 %v308_v30, %v307_v33  ;;  %v245_v30 = vsel %vm183_vm0, %v182_v27, 0.0 }
  0x35   : > { %v212_v2 = vadd.f32 %v211_v56, %v210_v60  ;;  %v318_v60 = vsel %vm183_vm0, %v271_v47, 0.0  ;;  %v283_v47 = vmul.f32 %v179_v9, %v179_v9 }
  0x36   : > { %v311_v45 = vadd.f32 %v310_v36, %v309_v39  ;;  %v332_v36 = vsel %vm183_vm0, %v278_v25, 0.0  ;;  %v281_v39 = vmul.f32 %v177_v61, %v177_v61 }
  0x37   : > { %v214_v8 = vadd.f32 %v213_v62, %v212_v2  ;;  %v320_v2 = vsel %vm183_vm0, %v272_v53, 0.0 }
  0x38   : > { %v313_v51 = vadd.f32 %v312_v42, %v311_v45 }
  0x39   : > { %v216_v14 = vadd.f32 %v215_v4, %v214_v8  ;;  %v322_v8 = vsel %vm183_vm0, %v273_v59, 0.0  ;;  %v286_v59 = vmul.f32 %v182_v27, %v182_v27 }
  0x3a   : > { %v315_v57 = vadd.f32 %v314_v48, %v313_v51  ;;  %v338_v48 = vsel %vm183_vm0, %v281_v39, 0.0  ;;  %v284_v51 = vmul.f32 %v180_v15, %v180_v15 }
  0x3b   : > { %v218_v20 = vadd.f32 %v217_v10, %v216_v14  ;;  %v324_v14 = vsel %vm183_vm0, %v274_v1, 0.0  ;;  %v348_v1 = vsel %vm183_vm0, %v286_v59, 0.0 }
  0x3c   : > { %v317_v63 = vadd.f32 %v316_v54, %v315_v57 }
  0x3d   : > { %v220_v26 = vadd.f32 %v219_v16, %v218_v20  ;;  %v326_v20 = vsel %vm183_vm0, %v275_v7, 0.0 }
  0x3e   : > { %v319_v5 = vadd.f32 %v318_v60, %v317_v63  ;;  %v344_v60 = vsel %vm183_vm0, %v284_v51, 0.0  ;;  %v346_v63 = vsel %vm183_vm0, %v285_v55, 0.0 }
  0x3f   : > { %v222_v32 = vadd.f32 %v221_v22, %v220_v26  ;;  %v328_v26 = vsel %vm183_vm0, %v276_v13, 0.0 }
  0x40   : > { %v321_v11 = vadd.f32 %v320_v2, %v319_v5 }
  0x41   : > { %v224_v38 = vadd.f32 %v223_v28, %v222_v32  ;;  %v330_v32 = vsel %vm183_vm0, %v277_v19, 0.0 }
  0x42   : > { %v323_v17 = vadd.f32 %v322_v8, %v321_v11 }
  0x43   : > { %v226_v44 = vadd.f32 %v225_v34, %v224_v38 }
  0x44   : > { %v325_v23 = vadd.f32 %v324_v14, %v323_v17 }
  0x45   : > { %v228_v50 = vadd.f32 %v227_v40, %v226_v44  ;;  %v334_v40 = vsel %vm183_vm0, %v279_v31, 0.0  ;;  %v336_v44 = vsel %vm183_vm0, %v280_v35, 0.0 }
  0x46   : > { %v327_v29 = vadd.f32 %v326_v20, %v325_v23 }
  0x47   : > { %v230_v56 = vadd.f32 %v229_v46, %v228_v50 }
  0x48   : > { %v329_v34 = vadd.f32 %v328_v26, %v327_v29 }
  0x49   : > { %v232_v62 = vadd.f32 %v231_v52, %v230_v56  ;;  %v340_v52 = vsel %vm183_vm0, %v282_v43, 0.0  ;;  %v342_v56 = vsel %vm183_vm0, %v283_v47, 0.0 }
  0x4a   : > { %v331_v38 = vadd.f32 %v330_v32, %v329_v34 }
  0x4b   : > { %v234_v4 = vadd.f32 %v233_v58, %v232_v62 }
  0x4c   : > { %v333_v42 = vadd.f32 %v332_v36, %v331_v38 }
  0x4d   : > { %v236_v10 = vadd.f32 %v235_v0, %v234_v4 }
  0x4e   : > { %v335_v46 = vadd.f32 %v334_v40, %v333_v42 }
  0x4f   : > { %v238_v16 = vadd.f32 %v237_v6, %v236_v10 }
  0x50   : > { %v337_v50 = vadd.f32 %v336_v44, %v335_v46 }
  0x51   : > { %v240_v22 = vadd.f32 %v239_v12, %v238_v16 }
  0x52   : > { %v339_v54 = vadd.f32 %v338_v48, %v337_v50 }
  0x53   : > { %v242_v28 = vadd.f32 %v241_v18, %v240_v22 }
  0x54   : > { %v341_v58 = vadd.f32 %v340_v52, %v339_v54 }
  0x55   : > { %v244_v33 = vadd.f32 %v243_v24, %v242_v28 }
  0x56   : > { %v343_v62 = vadd.f32 %v342_v56, %v341_v58 }
  0x57   : > { %v246_v37 = vadd.f32 %v245_v30, %v244_v33 }
  0x58   : > { %v345_v0 = vadd.f32 %v344_v60, %v343_v62 }
  0x59   : > { %v247_v41 = vrot.slane %v246_v37, 4 }
  0x5b   : > { %v248_v45 = vadd.f32 %v247_v41, %v246_v37 }
  0x5d   : > { %v249_v49 = vrot.slane %v248_v45, 2 }
  0x5f   : > { %v250_v53 = vadd.f32 %v249_v49, %v248_v45 }
  0x61   : > { %v251_v57 = vrot.slane %v250_v53, 1 }
  0x63   : > { %v252_v61 = vadd.f32 %v251_v57, %v250_v53 }
  0x65   : > { %254 = vst.msk [vmem:[%s139_s27] sm:$0x1] %vm253_vm1, %v252_v61 }
  0x66   : > { %538 = shalt.err (!%p535_p3)
}
  0x67   : > { %s539_s16 = scalar_lea.hbm %s795_s4, 16  ;;  %s543_s22 = scalar_lea.hbm %s865_s1, 32 }
  0x68   : > { %p540_p4 = scmp.ne.s32.totalorder %s795_s4, %s539_s16  ;;  %p544_p9 = scmp.lt.s32.totalorder %s795_s4, %s865_s1 }
  0x69   : > { %p545_p10 = scmp.lt.s32.totalorder %s543_s22, %s539_s16 }
  0x6a   : > { %p541_p7 = pnand %p540_p4, %p672_p5 }
  0x6b   : > { %p546_p11 = por %p545_p10, %p544_p9 }
  0x6c   : > { %p542_p8 = pneg %p541_p7 }
  0x6e   : > { %p547_p12 = pnand %p546_p11, %p542_p8 }
  0x70   : > { %550 = shalt.err (!%p547_p12)
}
  0x71   : > { %481 = dma.vmem_to_hbm [thread:$0]  (%p672_p5), %s787_s28, 16, %s795_s4, %s358_s5   ;;  %v347_v2 = vadd.f32 %v346_v63, %v345_v0 }
  0x72   : > { %s145_s25 = scalar_lea.vmem [#allocation4], %s779_s26  ;;  %s385_s28 = scalar_lea.hbm %s866_s2, %s476_s29 }
  0x73   : > { %v349_v3 = vadd.f32 %v348_v1, %v347_v2  ;;  %s387_s27 = sshll.u32 %s145_s25, 4  ;;  %s362_s4 = scalar_lea.sflag [#allocation5], %s779_s26  ;;  %s822_s27 = int_to_ptr.vmem [resolvable:$true] %s387_s27 }
  0x74   : > { %s551_s5 = scalar_lea.vmem %s822_s27, 16  ;;  %s618_s6 = smov [#allocation4]  }
  0x75   : > { %v350_v4 = vrot.slane %v349_v3, 4  ;;  %p552_p13 = scmp.ne.s32.totalorder %s822_s27, %s551_s5  ;;  %s555_s7 = sshll.u32 %s618_s6, 4  ;;  %s556_s7 = int_to_ptr.vmem [resolvable:$false] %s555_s7 }
  0x76   : > { %s557_s8 = scalar_lea.vmem %s556_s7, 32  ;;  %p558_p2 = scmp.lt.s32.totalorder %s822_s27, %s556_s7 }
  0x77   : > { %v351_v5 = vadd.f32 %v350_v4, %v349_v3  ;;  %p553_p0 = pnand %p552_p13, %p672_p5  ;;  %p559_p3 = scmp.lt.s32.totalorder %s557_s8, %s551_s5 }
  0x79   : > { %v352_v6 = vrot.slane %v351_v5, 2  ;;  %p554_p1 = pneg %p553_p0  ;;  %p560_p4 = por %p559_p3, %p558_p2 }
  0x7b   : > { %v353_v7 = vadd.f32 %v352_v6, %v351_v5  ;;  %p561_p7 = pnand %p560_p4, %p554_p1 }
  0x7d   : > { %v354_v8 = vrot.slane %v353_v7, 1 }
  0x7f   : > { %v355_v9 = vadd.f32 %v354_v8, %v353_v7 }
  0x81   : > { %356 = vst.msk [vmem:[%s145_s25] sm:$0x1] %vm253_vm1, %v355_v9 }
  0x82   : > { %564 = shalt.err (!%p561_p7)
}
  0x83   : > { %s565_s13 = scalar_lea.hbm %s385_s28, 16  ;;  %s569_s14 = scalar_lea.hbm %s866_s2, 32 }
  0x84   : > { %p566_p8 = scmp.ne.s32.totalorder %s385_s28, %s565_s13  ;;  %p570_p11 = scmp.lt.s32.totalorder %s385_s28, %s866_s2 }
  0x85   : > { %p571_p12 = scmp.lt.s32.totalorder %s569_s14, %s565_s13 }
  0x86   : > { %p567_p9 = pnand %p566_p8, %p672_p5 }
  0x87   : > { %p572_p13 = por %p571_p12, %p570_p11 }
  0x88   : > { %p568_p10 = pneg %p567_p9 }
  0x8a   : > { %p573_p0 = pnand %p572_p13, %p568_p10 }
  0x8c   : > { %576 = shalt.err (!%p573_p0)
}
  0x8d   : > { %482 = dma.vmem_to_hbm [thread:$0]  (%p672_p5), %s822_s27, 16, %s385_s28, %s362_s4  }
  0x8e PF: > { %p492_p1 = scmp.ge.s32.totalorder %s615_s12, 2  ;;  %s399_s21 = sand.u32 1, %s603_s9  }
  0x8f   : > { %s400_s22 = scalar_lea.sflag [#allocation3], %s399_s21 }
  0x90   : > { %p486_p2 = pnand %p492_p1, %p676_p6 }
  0x92   : > { %p487_p3 = pneg %p486_p2 }
  0x94   : > { %594 = dma.done.wait (%p487_p3), %s400_s22, 16  }
  0x95   : > { %596 = vsyncadd (%p487_p3), %s400_s22, 4294967280  ;;  %s408_s23 = scalar_lea.sflag [#allocation5], %s399_s21 }
  0x96   : > { %598 = dma.done.wait (%p487_p3), %s408_s23, 16  }
  0x97   : > { %600 = vsyncadd (%p487_p3), %s408_s23, 4294967280  ;;  %p16_p5 = scmp.ge.s32.totalorder %s659_s15, 4   ;;  %s869_s9 = smov %s607_s10 }
  0x98   : > { %s870_s10 = smov %s611_s11  ;;  %s871_s11 = smov %s670_s18 }
  0x99   : > { %s872_s12 = smov %s659_s15  ;;  %18 = sbr.rel (!%p16_p5) target bundleno = 5 (0x5), region = 76 }
  0x9e   :  { %412 = vsyncpa [#allocation3], 1 }
  0x9f   :  { %414 = vsyncpa [#allocation3 + $0x1], 1 }
  0xa0   :  { %415 = vsyncpa [#allocation5], 1 }
  0xa1   :  { %417 = vsyncpa [#allocation5 + $0x1], 1 }

</bundles_post_ra>
